<compile_context>
chip_gen: v6e
topology: v6e:2x2x1
jax: 0.10.0
libtpu: 0.0.40
codegen_flags: <defaults>
</compile_context>

<pallas_src>
import functools

import jax
import jax.numpy as jnp
from jax.experimental import pallas as pl
from jax.experimental.pallas import tpu as pltpu


def _round_up(v, m):
    return ((v + m - 1) // m) * m


def _n3h_kernel(x_ref, w1_ref, b1_ref, w2_ref, b2_ref, w3_ref, b3_ref, o_ref,
                *, bound, afunc):
    x = x_ref[...]                                                        # (TB, D)
    h1 = afunc(jnp.dot(x, w1_ref[...],
                       preferred_element_type=jnp.float32) + b1_ref[...])  # (TB, K*M)
    h2 = afunc(jnp.dot(h1, w2_ref[...],
                       preferred_element_type=jnp.float32) + b2_ref[...])  # (TB, K*M)
    y = jnp.dot(h2, w3_ref[...],
                preferred_element_type=jnp.float32) + b3_ref[...]          # (TB, K)
    o_ref[...] = jnp.clip(y, -bound, bound).astype(o_ref.dtype)            # hardtanh


def n3h_forward(x, w1, b1, w2, b2, w3, b3, bound, afunc=jax.nn.relu):
    """Pallas implementation of N3h.forward. Returns (B, dim_out)."""
    B = x.shape[0]
    xf = x.reshape(B, -1)                       # (B, D), row-major like .view
    K, D, M = w1.shape                          # dim_out, dim_in, module_size
    KM = K * M
    assert xf.shape[1] == D

    # ---- one-time weight re-layouts (plain XLA, outside the kernel) ----
    # layer 1: (K, D, M) -> (D, K*M)   so  h1[b, k*M+m] = sum_d x[b,d] * w1[k,d,m]
    w1f = jnp.transpose(w1, (1, 0, 2)).reshape(D, KM)
    b1f = b1.reshape(1, KM)
    # layer 2: block-diagonal (K*M, K*M):  bd[k*M+m, k'*M+n] = w2[k,m,n] * (k==k')
    eye = jnp.eye(K, dtype=w2.dtype)
    w2bd = (eye[:, None, :, None] * w2[:, :, None, :]).reshape(KM, KM)
    b2f = b2.reshape(1, KM)
    # layer 3: (K*M, K) scatter:  w3s[k*M+m, k'] = w3[k,m,0] * (k==k')
    w3s = (w3[:, :, 0][:, :, None] * eye[:, None, :]).reshape(KM, K)
    b3f = b3.reshape(1, K)

    # ---- batch tiling (only grid axis; "parallel" for megacore) ----
    TB = _round_up(B, 8) if B <= 512 else 512
    Bp = _round_up(B, TB)
    if Bp != B:
        xf = jnp.pad(xf, ((0, Bp - B), (0, 0)))

    out = pl.pallas_call(
        functools.partial(_n3h_kernel, bound=bound, afunc=afunc),
        out_shape=jax.ShapeDtypeStruct((Bp, K), xf.dtype),
        grid_spec=pltpu.PrefetchScalarGridSpec(
            num_scalar_prefetch=0,
            grid=(Bp // TB,),
            in_specs=[
                pl.BlockSpec((TB, D), lambda i: (i, 0)),     # x: streamed per batch tile
                pl.BlockSpec((D, KM), lambda i: (0, 0)),     # weights: constant index map
                pl.BlockSpec((1, KM), lambda i: (0, 0)),     #   -> resident, single DMA
                pl.BlockSpec((KM, KM), lambda i: (0, 0)),
                pl.BlockSpec((1, KM), lambda i: (0, 0)),
                pl.BlockSpec((KM, K), lambda i: (0, 0)),
                pl.BlockSpec((1, K), lambda i: (0, 0)),
            ],
            out_specs=pl.BlockSpec((TB, K), lambda i: (i, 0)),  # lane-dense (B, dim_out)
        ),
        compiler_params=pltpu.CompilerParams(
            dimension_semantics=("parallel",)),
    )(xf, w1f, b1f, w2bd, b2f, w3s, b3f)

    return out[:B]


def n3h_reference(x, w1, b1, w2, b2, w3, b3, bound, afunc=jax.nn.relu):
    """Pure-JAX reference matching the PyTorch N3h.forward semantics."""
    B = x.shape[0]
    xf = x.reshape(B, -1)
    h1 = afunc(jnp.einsum('bd,kdm->kbm', xf, w1) + b1)        # (K, B, M)
    h2 = afunc(jnp.einsum('kbm,kmn->kbn', h1, w2) + b2)       # (K, B, M)
    y = jnp.einsum('kbm,kml->kbl', h2, w3) + b3               # (K, B, 1)
    y = jnp.clip(y, -bound, bound)                            # hardtanh
    return y[:, :, 0].T                                       # (B, K)


if __name__ == "__main__":
    # Small, deterministic configuration.
    shape_in = (4, 8)          # -> dim_in = 32
    dim_out = 8
    module_size = 16           # must be > 2
    bound = 2.0
    batch = 2
    dim_in = 1
    for s in shape_in:
        dim_in *= s

    key = jax.random.PRNGKey(0)
    k1, k2, k3, k4, k5, k6, kx = jax.random.split(key, 7)

    # uniform(-std, std), std = 1/sqrt(dim_in), mirroring the module init
    std = 1.0 / dim_in ** 0.5
    w1 = jax.random.uniform(k1, (dim_out, dim_in, module_size), jnp.float32, -std, std)
    b1 = jax.random.uniform(k2, (dim_out, 1, module_size), jnp.float32, -std, std)
    w2 = jax.random.uniform(k3, (dim_out, module_size, module_size), jnp.float32, -std, std)
    b2 = jax.random.uniform(k4, (dim_out, 1, module_size), jnp.float32, -std, std)
    w3 = jax.random.uniform(k5, (dim_out, module_size, 1), jnp.float32, -std, std)
    b3 = jax.random.uniform(k6, (dim_out, 1, 1), jnp.float32, -std, std)

    x = jax.random.normal(kx, (batch,) + shape_in, jnp.float32)

    out = n3h_forward(x, w1, b1, w2, b2, w3, b3, bound)   # afunc = relu
    out = jax.block_until_ready(out)

    ref = n3h_reference(x, w1, b1, w2, b2, w3, b3, bound)
    assert out.shape == (batch, dim_out), out.shape
    assert jnp.allclose(out, ref, atol=2e-5, rtol=2e-5), (out, ref)
    print("KERNEL_OK")
</pallas_src>

<mosaic_0001>
module attributes {stable_mosaic.version = 11 : i64} {
  func.func @_n3h_kernel(%arg0: i32, %arg1: memref<8x32xf32, #tpu.memory_space<vmem>>, %arg2: memref<32x128xf32, #tpu.memory_space<vmem>>, %arg3: memref<1x128xf32, #tpu.memory_space<vmem>>, %arg4: memref<128x128xf32, #tpu.memory_space<vmem>>, %arg5: memref<1x128xf32, #tpu.memory_space<vmem>>, %arg6: memref<128x8xf32, #tpu.memory_space<vmem>>, %arg7: memref<1x8xf32, #tpu.memory_space<vmem>>, %arg8: memref<8x8xf32, #tpu.memory_space<vmem>>) attributes {dimension_semantics = [#tpu.dimension_semantics<parallel>], iteration_bounds = array<i64: 1>, scalar_prefetch = 0 : i64, scratch_operands = 0 : i64, tpu.core_type = #tpu.core_type<tc>, window_params = [{transform_indices = @transform_0, window_bounds = array<i64: 8, 32>}, {pipeline_mode = #tpu.pipeline_mode<synchronous>, transform_indices = @transform_1, window_bounds = array<i64: 32, 128>}, {pipeline_mode = #tpu.pipeline_mode<synchronous>, transform_indices = @transform_2, window_bounds = array<i64: 1, 128>}, {pipeline_mode = #tpu.pipeline_mode<synchronous>, transform_indices = @transform_3, window_bounds = array<i64: 128, 128>}, {pipeline_mode = #tpu.pipeline_mode<synchronous>, transform_indices = @transform_4, window_bounds = array<i64: 1, 128>}, {pipeline_mode = #tpu.pipeline_mode<synchronous>, transform_indices = @transform_5, window_bounds = array<i64: 128, 8>}, {pipeline_mode = #tpu.pipeline_mode<synchronous>, transform_indices = @transform_6, window_bounds = array<i64: 1, 8>}, {transform_indices = @transform_7, window_bounds = array<i64: 8, 8>}]} {
    %c0 = arith.constant 0 : index
    %c0_0 = arith.constant 0 : index
    %0 = vector.load %arg1[%c0, %c0_0] : memref<8x32xf32, #tpu.memory_space<vmem>>, vector<8x32xf32>
    %c0_1 = arith.constant 0 : index
    %c0_2 = arith.constant 0 : index
    %1 = vector.load %arg2[%c0_1, %c0_2] : memref<32x128xf32, #tpu.memory_space<vmem>>, vector<32x128xf32>
    %cst = arith.constant dense<0.000000e+00> : vector<8x128xf32>
    %2 = tpu.matmul %0, %1, %cst {dimension_numbers = #tpu.dot_dimension_numbers<[1], [0], [0], [1], [0, 0, 1, 1], [], []>} : vector<8x32xf32>, vector<32x128xf32>, vector<8x128xf32> -> vector<8x128xf32>
    %c0_3 = arith.constant 0 : index
    %c0_4 = arith.constant 0 : index
    %3 = vector.load %arg3[%c0_3, %c0_4] : memref<1x128xf32, #tpu.memory_space<vmem>>, vector<1x128xf32>
    %4 = vector.broadcast %3 : vector<1x128xf32> to vector<8x128xf32>
    %5 = arith.addf %2, %4 : vector<8x128xf32>
    %cst_5 = arith.constant 0.000000e+00 : f32
    %6 = vector.broadcast %cst_5 : f32 to vector<8x128xf32>
    %7 = arith.maximumf %5, %6 : vector<8x128xf32>
    %c0_6 = arith.constant 0 : index
    %c0_7 = arith.constant 0 : index
    %8 = vector.load %arg4[%c0_6, %c0_7] : memref<128x128xf32, #tpu.memory_space<vmem>>, vector<128x128xf32>
    %cst_8 = arith.constant dense<0.000000e+00> : vector<8x128xf32>
    %9 = tpu.matmul %7, %8, %cst_8 {dimension_numbers = #tpu.dot_dimension_numbers<[1], [0], [0], [1], [0, 0, 1, 1], [], []>} : vector<8x128xf32>, vector<128x128xf32>, vector<8x128xf32> -> vector<8x128xf32>
    %c0_9 = arith.constant 0 : index
    %c0_10 = arith.constant 0 : index
    %10 = vector.load %arg5[%c0_9, %c0_10] : memref<1x128xf32, #tpu.memory_space<vmem>>, vector<1x128xf32>
    %11 = vector.broadcast %10 : vector<1x128xf32> to vector<8x128xf32>
    %12 = arith.addf %9, %11 : vector<8x128xf32>
    %cst_11 = arith.constant 0.000000e+00 : f32
    %13 = vector.broadcast %cst_11 : f32 to vector<8x128xf32>
    %14 = arith.maximumf %12, %13 : vector<8x128xf32>
    %c0_12 = arith.constant 0 : index
    %c0_13 = arith.constant 0 : index
    %15 = vector.load %arg6[%c0_12, %c0_13] : memref<128x8xf32, #tpu.memory_space<vmem>>, vector<128x8xf32>
    %cst_14 = arith.constant dense<0.000000e+00> : vector<8x8xf32>
    %16 = tpu.matmul %14, %15, %cst_14 {dimension_numbers = #tpu.dot_dimension_numbers<[1], [0], [0], [1], [0, 0, 1, 1], [], []>} : vector<8x128xf32>, vector<128x8xf32>, vector<8x8xf32> -> vector<8x8xf32>
    %c0_15 = arith.constant 0 : index
    %c0_16 = arith.constant 0 : index
    %17 = vector.load %arg7[%c0_15, %c0_16] : memref<1x8xf32, #tpu.memory_space<vmem>>, vector<1x8xf32>
    %18 = vector.broadcast %17 : vector<1x8xf32> to vector<8x8xf32>
    %19 = arith.addf %16, %18 : vector<8x8xf32>
    %cst_17 = arith.constant -2.000000e+00 : f32
    %cst_18 = arith.constant 2.000000e+00 : f32
    %20 = vector.broadcast %cst_17 : f32 to vector<8x8xf32>
    %21 = arith.maximumf %20, %19 : vector<8x8xf32>
    %22 = vector.broadcast %cst_18 : f32 to vector<8x8xf32>
    %23 = arith.minimumf %22, %21 : vector<8x8xf32>
    %c0_19 = arith.constant 0 : index
    %c0_20 = arith.constant 0 : index
    %24 = vector.load %arg8[%c0_19, %c0_20] : memref<8x8xf32, #tpu.memory_space<vmem>>, vector<8x8xf32>
    tpu.vector_store %arg8[%c0_19, %c0_20], %23 {strides = array<i32>} : memref<8x8xf32, #tpu.memory_space<vmem>>, vector<8x8xf32>,
    return
  }
  func.func @transform_0(%arg0: i32) -> (i32, i32) {
    %c0_i32 = arith.constant 0 : i32
    %c0_i32_0 = arith.constant 0 : i32
    return %arg0, %c0_i32 : i32, i32
  }
  func.func @transform_1(%arg0: i32) -> (i32, i32) {
    %c0_i32 = arith.constant 0 : i32
    %c0_i32_0 = arith.constant 0 : i32
    %c0_i32_1 = arith.constant 0 : i32
    return %c0_i32, %c0_i32_0 : i32, i32
  }
  func.func @transform_2(%arg0: i32) -> (i32, i32) {
    %c0_i32 = arith.constant 0 : i32
    %c0_i32_0 = arith.constant 0 : i32
    %c0_i32_1 = arith.constant 0 : i32
    return %c0_i32, %c0_i32_0 : i32, i32
  }
  func.func @transform_3(%arg0: i32) -> (i32, i32) {
    %c0_i32 = arith.constant 0 : i32
    %c0_i32_0 = arith.constant 0 : i32
    %c0_i32_1 = arith.constant 0 : i32
    return %c0_i32, %c0_i32_0 : i32, i32
  }
  func.func @transform_4(%arg0: i32) -> (i32, i32) {
    %c0_i32 = arith.constant 0 : i32
    %c0_i32_0 = arith.constant 0 : i32
    %c0_i32_1 = arith.constant 0 : i32
    return %c0_i32, %c0_i32_0 : i32, i32
  }
  func.func @transform_5(%arg0: i32) -> (i32, i32) {
    %c0_i32 = arith.constant 0 : i32
    %c0_i32_0 = arith.constant 0 : i32
    %c0_i32_1 = arith.constant 0 : i32
    return %c0_i32, %c0_i32_0 : i32, i32
  }
  func.func @transform_6(%arg0: i32) -> (i32, i32) {
    %c0_i32 = arith.constant 0 : i32
    %c0_i32_0 = arith.constant 0 : i32
    %c0_i32_1 = arith.constant 0 : i32
    return %c0_i32, %c0_i32_0 : i32, i32
  }
  func.func @transform_7(%arg0: i32) -> (i32, i32) {
    %c0_i32 = arith.constant 0 : i32
    %c0_i32_0 = arith.constant 0 : i32
    return %arg0, %c0_i32 : i32, i32
  }
}

</mosaic_0001>

<bundles_post_ra>
// kernel: tpu_custom_call.1
= control target key start
LH: loop header
LB: loop body
LE: loop exit
PB: predicated region body
PF: predicated region fallthrough
CT: control target
= control target key end

     0   :  { %12 = vsyncpa [#allocation3], 0  ;;  %s748_s0 = inlined_call_operand.vmem [shape: f32[8,32], index: 0, kind: input, shape index: {}]   ;;  %s749_s1 = inlined_call_operand.hbm [shape: f32[32,128], index: 1, kind: input, shape index: {}]   ;;  %s750_s2 = inlined_call_operand.vmem [shape: f32[1,128], index: 2, kind: input, shape index: {}]   ;;  %s751_s3 = inlined_call_operand.vmem [shape: f32[128,128], index: 3, kind: input, shape index: {}]   ;;  %s752_s4 = inlined_call_operand.hbm [shape: f32[1,128], index: 4, kind: input, shape index: {}]   ;;  %s753_s5 = inlined_call_operand.vmem [shape: f32[128,8], index: 5, kind: input, shape index: {}]   ;;  %s754_s6 = inlined_call_operand.vmem [shape: f32[1,8], index: 6, kind: input, shape index: {}]   ;;  %s755_s7 = inlined_call_operand.hbm [shape: f32[8,8], index: 7, kind: output, shape index: {}]  }
   0x1   :  { %13 = vsyncpa [#allocation6], 0 }
   0x2   :  { %14 = vsyncpa [#allocation4], 0  ;;  %s545_s24 = smov [#allocation2]  }
   0x3   :  { %s22_s25 = sshll.u32 %s545_s24, 4  ;;  %s23_s25 = int_to_ptr.vmem [resolvable:$true] %s22_s25 }
   0x4   :  { %s487_s26 = scalar_lea.vmem %s23_s25, 512  ;;  %p492_p1 = scmp.lt.s32.totalorder %s23_s25, %s23_s25 }
   0x5   :  { %p488_p0 = scmp.ne.s32.totalorder %s23_s25, %s487_s26  ;;  %p493_p2 = scmp.lt.s32.totalorder %s487_s26, %s487_s26 }
   0x7   :  { %p494_p3 = por %p493_p2, %p492_p1 }
   0x9   :  { %p495_p4 = pnand %p494_p3, %p488_p0 }
   0xb   :  { %498 = shalt.err (!%p495_p4)
}
   0xc   :  { %s546_s27 = smov 128   ;;  %s547_s28 = smov 8  }
   0xd   :  { %28 = dma.hbm_to_vmem [thread:$0]  %s749_s1, 512, %s23_s25, [#allocation3], %s546_s27, %s546_s27, %s547_s28  }
   0xe   :  { %s548_s8 = smov [#allocation5]  }
   0xf   :  { %s39_s9 = sshll.u32 %s548_s8, 4  ;;  %s40_s9 = int_to_ptr.vmem [resolvable:$true] %s39_s9 }
  0x10   :  { %s507_s10 = scalar_lea.vmem %s40_s9, 16  ;;  %s511_s11 = scalar_lea.vmem %s40_s9, 32 }
  0x11   :  { %p508_p5 = scmp.ne.s32.totalorder %s40_s9, %s507_s10  ;;  %p512_p6 = scmp.lt.s32.totalorder %s40_s9, %s40_s9 }
  0x12   :  { %p513_p7 = scmp.lt.s32.totalorder %s511_s11, %s507_s10 }
  0x14   :  { %p514_p8 = por %p513_p7, %p512_p6 }
  0x16   :  { %p515_p9 = pnand %p514_p8, %p508_p5 }
  0x18   :  { %518 = shalt.err (!%p515_p9)
}
  0x19   :  { %42 = dma.hbm_to_vmem [thread:$0]  %s752_s4, 16, %s40_s9, [#allocation6]  }
  0x1a   :  { %539 = dma.done.wait [#allocation3], 512  }
  0x1b   :  { %540 = vsyncadd [#allocation3], 4294966784 }
  0x1c   :  { %541 = dma.done.wait [#allocation6], 16  }
  0x1d   :  { %542 = vsyncadd [#allocation6], 4294967280  ;;  %v549_v0 = vmov 0.0   ;;  %vm550_vm0 = vmmov 0   ;;  %v57_v1 = vld [vmem:[#allocation2 + $0x18] sm:$0xff]  ;;  %v56_v2 = vld [vmem:[#allocation2 + $0x10] sm:$0xff] }
  0x1e   :  { %391 = vmatprep.subr.mxu0 %v549_v0  ;;  %399 = vmatprep.mubr.msk.f32.mxu0 %vm550_vm0, %v549_v0  ;;  %v155_v3 = vld [vmem:[%s751_s3 + $0x78] sm:$0xff]  ;;  %v55_v4 = vld [vmem:[#allocation2 + $0x8] sm:$0xff]  ;;  %v154_v5 = vld [vmem:[%s751_s3 + $0x70] sm:$0xff]  ;;  %vm65_vm1 = vcmask 261120   ;;  %s551_s26 = smov [#allocation7]   ;;  %vm329_vm2 = vcmask 64512  }
  0x1f   :  { %402 = vmatprep.subr.mxu1 %v549_v0  ;;  %434 = vmatprep.mubr.msk.f32.mxu1 %vm550_vm0, %v549_v0  ;;  %v153_v6 = vld [vmem:[%s751_s3 + $0x68] sm:$0xff]  ;;  %v54_v7 = vld [vmem:[#allocation2] sm:$0xff]  ;;  %v151_v10 = vld [vmem:[%s751_s3 + $0x58] sm:$0xff]  ;;  %s337_s27 = sshll.u32 %s551_s26, 4  ;;  %s338_s27 = int_to_ptr.vmem [resolvable:$true] %s337_s27 }
  0x20   :  { %392 = vmatpush3.msra.mxu0 %v57_v1  ;;  %403 = vmatpush3.msra.mxu1 %v155_v3  ;;  %v53_v8 = vld [vmem:[%s748_s0] sm:$0xff]  ;;  %v150_v11 = vld [vmem:[%s751_s3 + $0x50] sm:$0xff]  ;;  %v149_v12 = vld [vmem:[%s751_s3 + $0x48] sm:$0xff]  ;;  %p524_p11 = scmp.lt.s32.totalorder %s338_s27, %s338_s27 }
  0x21   :  { %393 = vmatprep.subr.mxu0 %v549_v0  ;;  %404 = vmatprep.subr.mxu1 %v549_v0  ;;  %v152_v9 = vld [vmem:[%s751_s3 + $0x60] sm:$0xff]  ;;  %v147_v14 = vld [vmem:[%s751_s3 + $0x38] sm:$0xff]  ;;  %v146_v15 = vld [vmem:[%s751_s3 + $0x30] sm:$0xff] }
  0x22   :  { %394 = vmatpush3.msra.mxu0 %v56_v2  ;;  %405 = vmatpush3.msra.mxu1 %v154_v5  ;;  %v148_v13 = vld [vmem:[%s751_s3 + $0x40] sm:$0xff]  ;;  %v145_v16 = vld [vmem:[%s751_s3 + $0x28] sm:$0xff]  ;;  %v143_v18 = vld [vmem:[%s751_s3 + $0x18] sm:$0xff] }
  0x23   :  { %395 = vmatprep.subr.mxu0 %v549_v0  ;;  %406 = vmatprep.subr.mxu1 %v549_v0  ;;  %v144_v17 = vld [vmem:[%s751_s3 + $0x20] sm:$0xff]  ;;  %v142_v19 = vld [vmem:[%s751_s3 + $0x10] sm:$0xff]  ;;  %v141_v20 = vld [vmem:[%s751_s3 + $0x8] sm:$0xff] }
  0x24   :  { %396 = vmatpush3.msra.mxu0 %v55_v4  ;;  %407 = vmatpush3.msra.mxu1 %v153_v6  ;;  %v140_v21 = vld [vmem:[%s751_s3] sm:$0xff]  ;;  %v249_v22 = vld [vmem:[%s753_s5 + $0x78] sm:$0xff]  ;;  %v248_v23 = vld [vmem:[%s753_s5 + $0x70] sm:$0xff] }
  0x25   :  { %397 = vmatprep.subr.mxu0 %v549_v0  ;;  %408 = vmatprep.subr.mxu1 %v549_v0  ;;  %v247_v24 = vld [vmem:[%s753_s5 + $0x68] sm:$0xff]  ;;  %v246_v25 = vld [vmem:[%s753_s5 + $0x60] sm:$0xff]  ;;  %v245_v26 = vld [vmem:[%s753_s5 + $0x58] sm:$0xff] }
  0x26   :  { %398 = vmatpush3.msra.mxu0 %v54_v7  ;;  %409 = vmatpush3.msra.mxu1 %v152_v9  ;;  %v244_v27 = vld [vmem:[%s753_s5 + $0x50] sm:$0xff]  ;;  %v243_v28 = vld [vmem:[%s753_s5 + $0x48] sm:$0xff]  ;;  %v242_v29 = vld [vmem:[%s753_s5 + $0x40] sm:$0xff] }
  0x27   :  { %400 = vmatmul.mubr.msk.f32.vlgmr.msra.gmra.mxu0 %vm65_vm1, %v53_v8  ;;  %410 = vmatprep.subr.mxu1 %v549_v0  ;;  %v241_v30 = vld [vmem:[%s753_s5 + $0x38] sm:$0xff]  ;;  %v240_v31 = vld [vmem:[%s753_s5 + $0x30] sm:$0xff]  ;;  %v239_v32 = vld [vmem:[%s753_s5 + $0x28] sm:$0xff] }
  0x28   :  { %437 = vmatprep.subr.mxu0 %v549_v0  ;;  %411 = vmatpush3.msra.mxu1 %v151_v10  ;;  %v238_v33 = vld [vmem:[%s753_s5 + $0x20] sm:$0xff]  ;;  %v237_v34 = vld [vmem:[%s753_s5 + $0x18] sm:$0xff]  ;;  %v236_v40 = vld [vmem:[%s753_s5 + $0x10] sm:$0xff] }
  0x29   :  { %469 = vmatprep.mubr.msk.f32.mxu0 %vm550_vm0, %v549_v0  ;;  %412 = vmatprep.subr.mxu1 %v549_v0  ;;  %v347_v35 = vld [vmem:[%s750_s2] ss:$0 sm:$0xff]  ;;  %v235_v41 = vld [vmem:[%s753_s5 + $0x8] sm:$0xff] }
  0x2a   :  { %413 = vmatpush3.msra.mxu1 %v150_v11  ;;  %438 = vmatpush3.msra.mxu0 %v249_v22  ;;  %v234_v42 = vld [vmem:[%s753_s5] sm:$0xff]  ;;  %s519_s5 = scalar_lea.vmem %s338_s27, 128 }
  0x2b   :  { %414 = vmatprep.subr.mxu1 %v549_v0  ;;  %439 = vmatprep.subr.mxu0 %v549_v0  ;;  %v349_v43 = vld [vmem:[#allocation5] ss:$0 sm:$0xff]  ;;  %p520_p10 = scmp.ne.s32.totalorder %s338_s27, %s519_s5  ;;  %p525_p12 = scmp.lt.s32.totalorder %s519_s5, %s519_s5 }
  0x2c   :  { %415 = vmatpush3.msra.mxu1 %v149_v12  ;;  %440 = vmatpush3.msra.mxu0 %v248_v23  ;;  %v350_v48 = vld [vmem:[%s754_s6] ss:$0 sm:$0xff] }
  0x2d   :  { %416 = vmatprep.subr.mxu1 %v549_v0  ;;  %441 = vmatprep.subr.mxu0 %v549_v0  ;;  %p526_p13 = por %p525_p12, %p524_p11 }
  0x2e   :  { %417 = vmatpush3.msra.mxu1 %v148_v13  ;;  %442 = vmatpush3.msra.mxu0 %v247_v24 }
  0x2f   :  { %418 = vmatprep.subr.mxu1 %v549_v0  ;;  %443 = vmatprep.subr.mxu0 %v549_v0  ;;  %p527_p0 = pnand %p526_p13, %p520_p10 }
  0x30   :  { %419 = vmatpush3.msra.mxu1 %v147_v14  ;;  %444 = vmatpush3.msra.mxu0 %v246_v25 }
  0x31   :  { %420 = vmatprep.subr.mxu1 %v549_v0  ;;  %445 = vmatprep.subr.mxu0 %v549_v0 }
  0x32   :  { %421 = vmatpush3.msra.mxu1 %v146_v15  ;;  %446 = vmatpush3.msra.mxu0 %v245_v26 }
  0x33   :  { %422 = vmatprep.subr.mxu1 %v549_v0  ;;  %447 = vmatprep.subr.mxu0 %v549_v0 }
  0x34   :  { %423 = vmatpush3.msra.mxu1 %v145_v16  ;;  %448 = vmatpush3.msra.mxu0 %v244_v27 }
  0x35   :  { %424 = vmatprep.subr.mxu1 %v549_v0  ;;  %449 = vmatprep.subr.mxu0 %v549_v0 }
  0x36   :  { %425 = vmatpush3.msra.mxu1 %v144_v17  ;;  %450 = vmatpush3.msra.mxu0 %v243_v28 }
  0x37   :  { %426 = vmatprep.subr.mxu1 %v549_v0  ;;  %451 = vmatprep.subr.mxu0 %v549_v0 }
  0x38   :  { %427 = vmatpush3.msra.mxu1 %v143_v18  ;;  %452 = vmatpush3.msra.mxu0 %v242_v29 }
  0x39   :  { %428 = vmatprep.subr.mxu1 %v549_v0  ;;  %453 = vmatprep.subr.mxu0 %v549_v0 }
  0x3a   :  { %429 = vmatpush3.msra.mxu1 %v142_v19  ;;  %454 = vmatpush3.msra.mxu0 %v241_v30 }
  0x3b   :  { %430 = vmatprep.subr.mxu1 %v549_v0  ;;  %455 = vmatprep.subr.mxu0 %v549_v0 }
  0x3c   :  { %431 = vmatpush3.msra.mxu1 %v141_v20  ;;  %456 = vmatpush3.msra.mxu0 %v240_v31 }
  0x3d   :  { %432 = vmatprep.subr.mxu1 %v549_v0  ;;  %457 = vmatprep.subr.mxu0 %v549_v0 }
  0x3e   :  { %433 = vmatpush3.msra.mxu1 %v140_v21  ;;  %458 = vmatpush3.msra.mxu0 %v239_v32 }
  0x3f   :  { %459 = vmatprep.subr.mxu0 %v549_v0 }
  0x40   :  { %460 = vmatpush3.msra.mxu0 %v238_v33 }
  0x41   :  { %461 = vmatprep.subr.mxu0 %v549_v0 }
  0x42   :  { %462 = vmatpush3.msra.mxu0 %v237_v34 }
  0x43   :  { %463 = vmatprep.subr.mxu0 %v549_v0 }
  0x44   :  { %464 = vmatpush3.msra.mxu0 %v236_v40 }
  0x45   :  { %465 = vmatprep.subr.mxu0 %v549_v0 }
  0x46   :  { %466 = vmatpush3.msra.mxu0 %v235_v41 }
  0x47   :  { %467 = vmatprep.subr.mxu0 %v549_v0 }
  0x48   :  { %468 = vmatpush3.msra.mxu0 %v234_v42 }
  0xe7   :  { %v135_v36 = vpop.f32.mrf.mxu0 }
  0xe8   :  { %v136_v37 = vadd.f32 %v347_v35, %v135_v36 }
  0xe9   :  { %v401_v38 = vpop.f32.mrf.mxu0 }
  0xea   :  { %v139_v39 = vmax.f32 %v136_v37, 0.0 }
  0xec   :  { %435 = vmatmul.mubr.f32.vlgmr.msra.gmra.mxu1 %v139_v39 }
 0x1ac   :  { %v229_v44 = vpop.f32.mrf.mxu1 }
 0x1ad   :  { %v230_v45 = vadd.f32 %v349_v43, %v229_v44 }
 0x1ae   :  { %v436_v46 = vpop.f32.mrf.mxu1 }
 0x1af   :  { %v233_v47 = vmax.f32 %v230_v45, 0.0 }
 0x1b1   :  { %470 = vmatmul.mubr.f32.vlgmr.msra.gmra.mxu0 %v233_v47 }
 0x271   :  { %v323_v49 = vpop.f32.mrf.mxu0 }
 0x272   :  { %v324_v50 = vadd.f32 %v350_v48, %v323_v49 }
 0x273   :  { %v471_v51 = vpop.f32.mrf.mxu0 }
 0x274   :  { %v351_v52 = vclamps-f32 %v324_v50, 2.0 }
 0x276   :  { %330 = vst.msk [vmem:[#allocation7] sm:$0xff] %vm329_vm2, %v351_v52 }
 0x277   :  { %530 = shalt.err (!%p527_p0)
}
 0x278   :  { %340 = dma.vmem_to_hbm [thread:$0]  %s338_s27, 128, %s755_s7, [#allocation4]  }
 0x279   :  { %543 = dma.done.wait [#allocation4], 128  }
 0x27a   :  { %544 = vsyncadd [#allocation4], 4294967168 }
 0x27b   :  { %344 = vsyncpa [#allocation3], 1 }
 0x27c   :  { %345 = vsyncpa [#allocation6], 1 }
 0x27d   :  { %346 = vsyncpa [#allocation4], 1 }

</bundles_post_ra>
